<compile_context>
chip_gen: v7x
topology: tpu7x:2x2x1
jax: 0.10.0
libtpu: 0.0.40
codegen_flags: <defaults>
</compile_context>

<pallas_src>
import jax
import jax.numpy as jnp
import numpy as np
from jax.experimental import pallas as pl
from jax.experimental.pallas import tpu as pltpu

N = 2
C_IN = 1
C_OUT = 6
H = W = 16
K = 5
OH = H - K + 1          # 12
OW = W - K + 1          # 12
PH = OH // 2            # 6
PW = OW // 2            # 6
OUTC = C_OUT * PH * PW  # 216 = flattened (c, ip, jp), PyTorch NCHW order
BLK = 256               # OUTC padded to a multiple of 128 -> aligned, unmasked stores


def _pool_gemm_index_constants():
    """Static (numpy) index/mask constants for the Toeplitz weight matrix."""
    r = np.arange(H)[:, None, None]          # input row
    a = np.arange(2)[None, :, None]          # pool-window row offset
    ip = np.arange(PH)[None, None, :]        # pooled output row
    kh = r - (2 * ip + a)                    # (H, 2, PH)

    s = np.arange(W)[:, None, None]          # input col
    bq = np.arange(2)[None, :, None]         # pool-window col offset
    jp = np.arange(PW)[None, None, :]        # pooled output col
    kw = s - (2 * jp + bq)                   # (W, 2, PW)

    vh = (kh >= 0) & (kh < K)
    vw = (kw >= 0) & (kw < K)
    valid = vh[:, :, :, None, None, None] & vw[None, None, None, :, :, :]
    return np.clip(kh, 0, K - 1), np.clip(kw, 0, K - 1), valid


_KHC, _KWC, _VALID = _pool_gemm_index_constants()


def _build_gemm_weights(w, b):
    """Pack conv weights/bias into a pooling-ordered GEMM weight matrix.

    M[(r, s), q*BLK + c*PH*PW + ip*PW + jp] = w[c, 0, kh, kw]
      with q = a*2 + b_off, kh = r - (2*ip + a), kw = s - (2*jp + b_off),
      and 0 when (kh, kw) falls outside the 5x5 kernel.  Then x_flat @ M gives,
      for every pool-window position q, the pre-ReLU conv output at
      (i, j) = (2*ip + a, 2*jp + b_off), already in NCHW flatten order, so the
      max-pool reduces to an elementwise max over the 4 column blocks.
    """
    wsq = w.reshape(C_OUT, K, K).astype(jnp.float32)
    g = wsq[:, _KHC, :][..., _KWC]                       # (C, H,2,PH, W,2,PW)
    g = jnp.where(_VALID[None], g, 0.0)
    m = jnp.transpose(g, (1, 4, 2, 5, 0, 3, 6))          # (H, W, 2, 2, C, PH, PW)
    m = m.reshape(H * W, 4, OUTC)
    m = jnp.pad(m, ((0, 0), (0, 0), (0, BLK - OUTC)))    # pad cols 216 -> 256
    m = m.reshape(H * W, 4 * BLK)                        # (256, 1024)

    brow = jnp.repeat(b.astype(jnp.float32), PH * PW)    # (216,): bias per (c,ip,jp)
    brow = jnp.tile(jnp.pad(brow, (0, BLK - OUTC)), 4)[None, :]   # (1, 1024)
    return m, brow


def conv_relu_pool_kernel(x_ref, m_ref, b_ref, o_ref):
    # x_ref: (N, H*W)     = (2, 256)    lane-dense input rows
    # m_ref: (H*W, 4*BLK) = (256, 1024) pooling-ordered Toeplitz conv weights
    # b_ref: (1, 4*BLK)   bias row (zero in padded columns)
    # o_ref: (N, BLK)     = (2, 256)    lane-dense output rows (216 used)
    # One MXU matmul does the conv for all channels / pixels / batch elements.
    y = jnp.dot(x_ref[...], m_ref[...], preferred_element_type=jnp.float32)
    y = jnp.maximum(y + b_ref[...], 0.0)                  # bias + ReLU, (N, 1024)
    # 2x2 / stride-2 max-pool == elementwise max of the 4 window-position
    # blocks; each block is a vreg-aligned 256-wide slice (no strided or
    # masked accesses anywhere).
    o_ref[...] = jnp.maximum(
        jnp.maximum(y[:, 0 * BLK:1 * BLK], y[:, 1 * BLK:2 * BLK]),
        jnp.maximum(y[:, 2 * BLK:3 * BLK], y[:, 3 * BLK:4 * BLK]))


@jax.jit
def simple_conv_forward(x, w, b):
    n = x.shape[0]
    x_flat = x.astype(jnp.float32).reshape(n, H * W)      # (N, 256) lane-dense
    m, brow = _build_gemm_weights(w, b)                   # weight-layout plumbing

    out_padded = pl.pallas_call(
        conv_relu_pool_kernel,
        out_shape=jax.ShapeDtypeStruct((n, BLK), jnp.float32),
        # Single grid step: whole arrays live in VMEM (~1 MiB weights + a few KB).
        # If N/H/W are ever scaled up, tile the GEMM rows with grid=(n_tiles,)
        # and dimension_semantics=("parallel",) so v7x's two TensorCores split
        # the batch; at this size a single step is fastest everywhere.
        in_specs=[
            pl.BlockSpec(memory_space=pltpu.MemorySpace.VMEM),
            pl.BlockSpec(memory_space=pltpu.MemorySpace.VMEM),
            pl.BlockSpec(memory_space=pltpu.MemorySpace.VMEM),
        ],
        out_specs=pl.BlockSpec(memory_space=pltpu.MemorySpace.VMEM),
    )(x_flat, m, brow)

    return out_padded[:, :OUTC].reshape(n, C_OUT, PH, PW)


def ref_forward(x, w, b):
    y = jax.lax.conv_general_dilated(
        x, w, window_strides=(1, 1), padding="VALID",
        dimension_numbers=("NCHW", "OIHW", "NCHW"))
    y = y + b[None, :, None, None]
    y = jnp.maximum(y, 0.0)
    y = jax.lax.reduce_window(y, -jnp.inf, jax.lax.max,
                              (1, 1, 2, 2), (1, 1, 2, 2), "VALID")
    return y


if __name__ == "__main__":
    key = jax.random.PRNGKey(0)
    kx, kwt, kb = jax.random.split(key, 3)
    x = jax.random.normal(kx, (N, C_IN, H, W), jnp.float32)
    w = jax.random.normal(kwt, (C_OUT, C_IN, K, K), jnp.float32) * 0.1
    b = jax.random.normal(kb, (C_OUT,), jnp.float32) * 0.1

    out = jax.block_until_ready(simple_conv_forward(x, w, b))

    ref = ref_forward(x, w, b)
    # GEMM re-association vs. XLA's conv changes f32 rounding slightly.
    np.testing.assert_allclose(np.asarray(out), np.asarray(ref), atol=1e-4, rtol=1e-4)
    print("KERNEL_OK")
</pallas_src>

<mosaic_0001>
module attributes {stable_mosaic.version = 11 : i64} {
  func.func @conv_relu_pool_kernel(%arg0: memref<2x256xf32, #tpu.memory_space<vmem>>, %arg1: memref<256x1024xf32, #tpu.memory_space<vmem>>, %arg2: memref<1x1024xf32, #tpu.memory_space<vmem>>, %arg3: memref<2x256xf32, #tpu.memory_space<vmem>>) attributes {dimension_semantics = [], scalar_prefetch = 0 : i64, scratch_operands = 0 : i64, tpu.core_type = #tpu.core_type<tc>} {
    %c0 = arith.constant 0 : index
    %c0_0 = arith.constant 0 : index
    %0 = vector.load %arg0[%c0, %c0_0] : memref<2x256xf32, #tpu.memory_space<vmem>>, vector<2x256xf32>
    %c0_1 = arith.constant 0 : index
    %c0_2 = arith.constant 0 : index
    %1 = vector.load %arg1[%c0_1, %c0_2] : memref<256x1024xf32, #tpu.memory_space<vmem>>, vector<256x1024xf32>
    %cst = arith.constant dense<0.000000e+00> : vector<2x1024xf32>
    %2 = tpu.matmul %0, %1, %cst {dimension_numbers = #tpu.dot_dimension_numbers<[1], [0], [0], [1], [0, 0, 1, 1], [], []>} : vector<2x256xf32>, vector<256x1024xf32>, vector<2x1024xf32> -> vector<2x1024xf32>
    %c0_3 = arith.constant 0 : index
    %c0_4 = arith.constant 0 : index
    %3 = vector.load %arg2[%c0_3, %c0_4] : memref<1x1024xf32, #tpu.memory_space<vmem>>, vector<1x1024xf32>
    %4 = vector.broadcast %3 : vector<1x1024xf32> to vector<2x1024xf32>
    %5 = arith.addf %2, %4 : vector<2x1024xf32>
    %cst_5 = arith.constant 0.000000e+00 : f32
    %6 = vector.broadcast %cst_5 : f32 to vector<2x1024xf32>
    %7 = arith.maximumf %5, %6 : vector<2x1024xf32>
    %8 = vector.extract_strided_slice %7 {offsets = [0, 0], sizes = [2, 256], strides = [1, 1]} : vector<2x1024xf32> to vector<2x256xf32>
    %9 = vector.extract_strided_slice %7 {offsets = [0, 256], sizes = [2, 256], strides = [1, 1]} : vector<2x1024xf32> to vector<2x256xf32>
    %10 = arith.maximumf %8, %9 : vector<2x256xf32>
    %11 = vector.extract_strided_slice %7 {offsets = [0, 512], sizes = [2, 256], strides = [1, 1]} : vector<2x1024xf32> to vector<2x256xf32>
    %12 = vector.extract_strided_slice %7 {offsets = [0, 768], sizes = [2, 256], strides = [1, 1]} : vector<2x1024xf32> to vector<2x256xf32>
    %13 = arith.maximumf %11, %12 : vector<2x256xf32>
    %14 = arith.maximumf %10, %13 : vector<2x256xf32>
    %c0_6 = arith.constant 0 : index
    %c0_7 = arith.constant 0 : index
    %15 = vector.load %arg3[%c0_6, %c0_7] : memref<2x256xf32, #tpu.memory_space<vmem>>, vector<2x256xf32>
    tpu.vector_store %arg3[%c0_6, %c0_7], %14 {strides = array<i32>} : memref<2x256xf32, #tpu.memory_space<vmem>>, vector<2x256xf32>,
    return
  }
}

</mosaic_0001>

<bundles_post_ra>
// kernel: simple_conv_forward.1
= control target key start
LH: loop header
LB: loop body
LE: loop exit
PB: predicated region body
PF: predicated region fallthrough
CT: control target
= control target key end

     0   :  { %s1707_s1 = inlined_call_operand.vmem [shape: f32[256,1024], index: 1, kind: input, shape index: {}]   ;;  %s1708_s0 = inlined_call_operand.vmem [shape: f32[2,256], index: 0, kind: input, shape index: {}]   ;;  %s1709_s2 = inlined_call_operand.vmem [shape: f32[1,1024], index: 2, kind: input, shape index: {}]   ;;  %s1710_s3 = inlined_call_operand.vmem [shape: f32[2,256], index: 3, kind: output, shape index: {}]  }
   0x1   :  { %v16_v0 = vld [vmem:[%s1707_s1 + $0x8] sm:$0xff]  ;;  %v18_v2 = vld [vmem:[%s1707_s1 + $0x18] sm:$0xff]  ;;  %v15_v5 = vld [vmem:[%s1707_s1] sm:$0xff] }
   0x2   :  { %v24_v1 = vld [vmem:[%s1707_s1 + $0x48] sm:$0xff]  ;;  %v26_v4 = vld [vmem:[%s1707_s1 + $0x58] sm:$0xff]  ;;  %v23_v6 = vld [vmem:[%s1707_s1 + $0x40] sm:$0xff] }
   0x3   :  { %v640_v3 = vpack.c.bf16 %v24_v1, %v16_v0  ;;  %v704_v7 = vpack.c.bf16 %v26_v4, %v18_v2  ;;  %v642_v8 = vpack.c.bf16 %v23_v6, %v15_v5  ;;  %v17_v9 = vld [vmem:[%s1707_s1 + $0x10] sm:$0xff]  ;;  %v32_v11 = vld [vmem:[%s1707_s1 + $0x88] sm:$0xff]  ;;  %v34_v14 = vld [vmem:[%s1707_s1 + $0x98] sm:$0xff] }
   0x4   :  { %v25_v10 = vld [vmem:[%s1707_s1 + $0x50] sm:$0xff]  ;;  %v40_v13 = vld [vmem:[%s1707_s1 + $0xc8] sm:$0xff]  ;;  %v42_v15 = vld [vmem:[%s1707_s1 + $0xd8] sm:$0xff] }
   0x5   :  { %641 = vmatprep.subr.bf16.mxu0 %v640_v3  ;;  %v706_v12 = vpack.c.bf16 %v25_v10, %v17_v9  ;;  %705 = vmatprep.subr.bf16.mxu1 %v704_v7  ;;  %v644_v16 = vpack.c.bf16 %v40_v13, %v32_v11  ;;  %v708_v17 = vpack.c.bf16 %v42_v15, %v34_v14  ;;  %v31_v18 = vld [vmem:[%s1707_s1 + $0x80] sm:$0xff]  ;;  %v33_v20 = vld [vmem:[%s1707_s1 + $0x90] sm:$0xff]  ;;  %v48_v23 = vld [vmem:[%s1707_s1 + $0x108] sm:$0xff] }
   0x6   :  { %643 = vmatpush1.bf16.msra.mxu0 %v642_v8  ;;  %v39_v19 = vld [vmem:[%s1707_s1 + $0xc0] sm:$0xff]  ;;  %v41_v22 = vld [vmem:[%s1707_s1 + $0xd0] sm:$0xff]  ;;  %v56_v24 = vld [vmem:[%s1707_s1 + $0x148] sm:$0xff] }
   0x7   :  { %707 = vmatpush1.bf16.msra.mxu1 %v706_v12  ;;  %v646_v21 = vpack.c.bf16 %v39_v19, %v31_v18  ;;  %645 = vmatprep.subr.bf16.mxu0 %v644_v16  ;;  %v710_v25 = vpack.c.bf16 %v41_v22, %v33_v20  ;;  %v648_v26 = vpack.c.bf16 %v56_v24, %v48_v23  ;;  %v50_v27 = vld [vmem:[%s1707_s1 + $0x118] sm:$0xff]  ;;  %v47_v29 = vld [vmem:[%s1707_s1 + $0x100] sm:$0xff]  ;;  %v49_v32 = vld [vmem:[%s1707_s1 + $0x110] sm:$0xff] }
   0x8   :  { %709 = vmatprep.subr.bf16.mxu1 %v708_v17  ;;  %v58_v28 = vld [vmem:[%s1707_s1 + $0x158] sm:$0xff]  ;;  %v55_v31 = vld [vmem:[%s1707_s1 + $0x140] sm:$0xff]  ;;  %v57_v33 = vld [vmem:[%s1707_s1 + $0x150] sm:$0xff] }
   0x9   :  { %v712_v30 = vpack.c.bf16 %v58_v28, %v50_v27  ;;  %v650_v34 = vpack.c.bf16 %v55_v31, %v47_v29  ;;  %v64_v35 = vld [vmem:[%s1707_s1 + $0x188] sm:$0xff]  ;;  %v66_v37 = vld [vmem:[%s1707_s1 + $0x198] sm:$0xff]  ;;  %v714_v38 = vpack.c.bf16 %v57_v33, %v49_v32  ;;  %v63_v41 = vld [vmem:[%s1707_s1 + $0x180] sm:$0xff] }
   0xa   :  { %647 = vmatpush1.bf16.msra.mxu0 %v646_v21  ;;  %v72_v36 = vld [vmem:[%s1707_s1 + $0x1c8] sm:$0xff]  ;;  %v74_v40 = vld [vmem:[%s1707_s1 + $0x1d8] sm:$0xff]  ;;  %v71_v42 = vld [vmem:[%s1707_s1 + $0x1c0] sm:$0xff] }
   0xb   :  { %711 = vmatpush1.bf16.msra.mxu1 %v710_v25  ;;  %649 = vmatprep.subr.bf16.mxu0 %v648_v26  ;;  %v652_v39 = vpack.c.bf16 %v72_v36, %v64_v35  ;;  %v716_v43 = vpack.c.bf16 %v74_v40, %v66_v37  ;;  %v65_v44 = vld [vmem:[%s1707_s1 + $0x190] sm:$0xff]  ;;  %v80_v46 = vld [vmem:[%s1707_s1 + $0x208] sm:$0xff]  ;;  %v82_v48 = vld [vmem:[%s1707_s1 + $0x218] sm:$0xff]  ;;  %v654_v50 = vpack.c.bf16 %v71_v42, %v63_v41 }
   0xc   :  { %713 = vmatprep.subr.bf16.mxu1 %v712_v30  ;;  %v73_v45 = vld [vmem:[%s1707_s1 + $0x1d0] sm:$0xff]  ;;  %v88_v47 = vld [vmem:[%s1707_s1 + $0x248] sm:$0xff]  ;;  %v90_v49 = vld [vmem:[%s1707_s1 + $0x258] sm:$0xff] }
   0xd   :  { %v718_v51 = vpack.c.bf16 %v73_v45, %v65_v44  ;;  %v656_v52 = vpack.c.bf16 %v88_v47, %v80_v46  ;;  %v79_v53 = vld [vmem:[%s1707_s1 + $0x200] sm:$0xff]  ;;  %v81_v55 = vld [vmem:[%s1707_s1 + $0x210] sm:$0xff]  ;;  %v720_v56 = vpack.c.bf16 %v90_v49, %v82_v48  ;;  %v96_v58 = vld [vmem:[%s1707_s1 + $0x288] sm:$0xff] }
   0xe   :  { %651 = vmatpush1.bf16.msra.mxu0 %v650_v34  ;;  %v87_v54 = vld [vmem:[%s1707_s1 + $0x240] sm:$0xff]  ;;  %v89_v57 = vld [vmem:[%s1707_s1 + $0x250] sm:$0xff]  ;;  %v104_v59 = vld [vmem:[%s1707_s1 + $0x2c8] sm:$0xff] }
   0xf   :  { %715 = vmatpush1.bf16.msra.mxu1 %v714_v38  ;;  %653 = vmatprep.subr.bf16.mxu0 %v652_v39  ;;  %v98_v60 = vld [vmem:[%s1707_s1 + $0x298] sm:$0xff]  ;;  %v658_v62 = vpack.c.bf16 %v87_v54, %v79_v53  ;;  %v722_v63 = vpack.c.bf16 %v89_v57, %v81_v55  ;;  %v660_v0 = vpack.c.bf16 %v104_v59, %v96_v58  ;;  %v95_v1 = vld [vmem:[%s1707_s1 + $0x280] sm:$0xff]  ;;  %v97_v3 = vld [vmem:[%s1707_s1 + $0x290] sm:$0xff] }
  0x10   :  { %717 = vmatprep.subr.bf16.mxu1 %v716_v43  ;;  %v106_v61 = vld [vmem:[%s1707_s1 + $0x2d8] sm:$0xff]  ;;  %v103_v2 = vld [vmem:[%s1707_s1 + $0x2c0] sm:$0xff]  ;;  %v105_v5 = vld [vmem:[%s1707_s1 + $0x2d0] sm:$0xff] }
  0x11   :  { %v724_v4 = vpack.c.bf16 %v106_v61, %v98_v60  ;;  %v112_v6 = vld [vmem:[%s1707_s1 + $0x308] sm:$0xff]  ;;  %v114_v8 = vld [vmem:[%s1707_s1 + $0x318] sm:$0xff]  ;;  %v662_v10 = vpack.c.bf16 %v103_v2, %v95_v1  ;;  %v726_v11 = vpack.c.bf16 %v105_v5, %v97_v3  ;;  %v111_v13 = vld [vmem:[%s1707_s1 + $0x300] sm:$0xff] }
  0x12   :  { %655 = vmatpush1.bf16.msra.mxu0 %v654_v50  ;;  %v120_v7 = vld [vmem:[%s1707_s1 + $0x348] sm:$0xff]  ;;  %v122_v9 = vld [vmem:[%s1707_s1 + $0x358] sm:$0xff]  ;;  %v119_v14 = vld [vmem:[%s1707_s1 + $0x340] sm:$0xff] }
  0x13   :  { %719 = vmatpush1.bf16.msra.mxu1 %v718_v51  ;;  %657 = vmatprep.subr.bf16.mxu0 %v656_v52  ;;  %v664_v12 = vpack.c.bf16 %v120_v7, %v112_v6  ;;  %v113_v15 = vld [vmem:[%s1707_s1 + $0x310] sm:$0xff]  ;;  %v728_v16 = vpack.c.bf16 %v122_v9, %v114_v8  ;;  %v128_v18 = vld [vmem:[%s1707_s1 + $0x388] sm:$0xff]  ;;  %v130_v20 = vld [vmem:[%s1707_s1 + $0x398] sm:$0xff]  ;;  %v666_v22 = vpack.c.bf16 %v119_v14, %v111_v13 }
  0x14   :  { %721 = vmatprep.subr.bf16.mxu1 %v720_v56  ;;  %v121_v17 = vld [vmem:[%s1707_s1 + $0x350] sm:$0xff]  ;;  %v136_v19 = vld [vmem:[%s1707_s1 + $0x3c8] sm:$0xff]  ;;  %v138_v21 = vld [vmem:[%s1707_s1 + $0x3d8] sm:$0xff] }
  0x15   :  { %v730_v23 = vpack.c.bf16 %v121_v17, %v113_v15  ;;  %v668_v24 = vpack.c.bf16 %v136_v19, %v128_v18  ;;  %v127_v25 = vld [vmem:[%s1707_s1 + $0x380] sm:$0xff]  ;;  %v129_v27 = vld [vmem:[%s1707_s1 + $0x390] sm:$0xff]  ;;  %v732_v28 = vpack.c.bf16 %v138_v21, %v130_v20  ;;  %v144_v30 = vld [vmem:[%s1707_s1 + $0x408] sm:$0xff] }
  0x16   :  { %659 = vmatpush1.bf16.msra.mxu0 %v658_v62  ;;  %v135_v26 = vld [vmem:[%s1707_s1 + $0x3c0] sm:$0xff]  ;;  %v137_v29 = vld [vmem:[%s1707_s1 + $0x3d0] sm:$0xff]  ;;  %v152_v31 = vld [vmem:[%s1707_s1 + $0x448] sm:$0xff] }
  0x17   :  { %723 = vmatpush1.bf16.msra.mxu1 %v722_v63  ;;  %661 = vmatprep.subr.bf16.mxu0 %v660_v0  ;;  %v146_v32 = vld [vmem:[%s1707_s1 + $0x418] sm:$0xff]  ;;  %v670_v34 = vpack.c.bf16 %v135_v26, %v127_v25  ;;  %v734_v35 = vpack.c.bf16 %v137_v29, %v129_v27  ;;  %v672_v36 = vpack.c.bf16 %v152_v31, %v144_v30  ;;  %v143_v37 = vld [vmem:[%s1707_s1 + $0x400] sm:$0xff]  ;;  %v145_v39 = vld [vmem:[%s1707_s1 + $0x410] sm:$0xff] }
  0x18   :  { %725 = vmatprep.subr.bf16.mxu1 %v724_v4  ;;  %v154_v33 = vld [vmem:[%s1707_s1 + $0x458] sm:$0xff]  ;;  %v151_v38 = vld [vmem:[%s1707_s1 + $0x440] sm:$0xff]  ;;  %v153_v41 = vld [vmem:[%s1707_s1 + $0x450] sm:$0xff] }
  0x19   :  { %v736_v40 = vpack.c.bf16 %v154_v33, %v146_v32  ;;  %v160_v42 = vld [vmem:[%s1707_s1 + $0x488] sm:$0xff]  ;;  %v162_v44 = vld [vmem:[%s1707_s1 + $0x498] sm:$0xff]  ;;  %v674_v46 = vpack.c.bf16 %v151_v38, %v143_v37  ;;  %v738_v47 = vpack.c.bf16 %v153_v41, %v145_v39  ;;  %v159_v49 = vld [vmem:[%s1707_s1 + $0x480] sm:$0xff] }
  0x1a   :  { %663 = vmatpush1.bf16.msra.mxu0 %v662_v10  ;;  %v168_v43 = vld [vmem:[%s1707_s1 + $0x4c8] sm:$0xff]  ;;  %v170_v45 = vld [vmem:[%s1707_s1 + $0x4d8] sm:$0xff]  ;;  %v167_v50 = vld [vmem:[%s1707_s1 + $0x4c0] sm:$0xff] }
  0x1b   :  { %727 = vmatpush1.bf16.msra.mxu1 %v726_v11  ;;  %665 = vmatprep.subr.bf16.mxu0 %v664_v12  ;;  %v676_v48 = vpack.c.bf16 %v168_v43, %v160_v42  ;;  %v161_v51 = vld [vmem:[%s1707_s1 + $0x490] sm:$0xff]  ;;  %v740_v52 = vpack.c.bf16 %v170_v45, %v162_v44  ;;  %v176_v54 = vld [vmem:[%s1707_s1 + $0x508] sm:$0xff]  ;;  %v178_v56 = vld [vmem:[%s1707_s1 + $0x518] sm:$0xff]  ;;  %v678_v58 = vpack.c.bf16 %v167_v50, %v159_v49 }
  0x1c   :  { %729 = vmatprep.subr.bf16.mxu1 %v728_v16  ;;  %v169_v53 = vld [vmem:[%s1707_s1 + $0x4d0] sm:$0xff]  ;;  %v184_v55 = vld [vmem:[%s1707_s1 + $0x548] sm:$0xff]  ;;  %v186_v57 = vld [vmem:[%s1707_s1 + $0x558] sm:$0xff] }
  0x1d   :  { %v742_v59 = vpack.c.bf16 %v169_v53, %v161_v51  ;;  %v680_v60 = vpack.c.bf16 %v184_v55, %v176_v54  ;;  %v175_v61 = vld [vmem:[%s1707_s1 + $0x500] sm:$0xff]  ;;  %v177_v63 = vld [vmem:[%s1707_s1 + $0x510] sm:$0xff]  ;;  %v744_v0 = vpack.c.bf16 %v186_v57, %v178_v56  ;;  %v192_v2 = vld [vmem:[%s1707_s1 + $0x588] sm:$0xff] }
  0x1e   :  { %667 = vmatpush1.bf16.msra.mxu0 %v666_v22  ;;  %v183_v62 = vld [vmem:[%s1707_s1 + $0x540] sm:$0xff]  ;;  %v185_v1 = vld [vmem:[%s1707_s1 + $0x550] sm:$0xff]  ;;  %v200_v3 = vld [vmem:[%s1707_s1 + $0x5c8] sm:$0xff] }
  0x1f   :  { %731 = vmatpush1.bf16.msra.mxu1 %v730_v23  ;;  %669 = vmatprep.subr.bf16.mxu0 %v668_v24  ;;  %v194_v4 = vld [vmem:[%s1707_s1 + $0x598] sm:$0xff]  ;;  %v682_v6 = vpack.c.bf16 %v183_v62, %v175_v61  ;;  %v191_v7 = vld [vmem:[%s1707_s1 + $0x580] sm:$0xff]  ;;  %v746_v8 = vpack.c.bf16 %v185_v1, %v177_v63  ;;  %v684_v9 = vpack.c.bf16 %v200_v3, %v192_v2  ;;  %v193_v11 = vld [vmem:[%s1707_s1 + $0x590] sm:$0xff] }
  0x20   :  { %733 = vmatprep.subr.bf16.mxu1 %v732_v28  ;;  %v202_v5 = vld [vmem:[%s1707_s1 + $0x5d8] sm:$0xff]  ;;  %v199_v10 = vld [vmem:[%s1707_s1 + $0x5c0] sm:$0xff]  ;;  %v201_v12 = vld [vmem:[%s1707_s1 + $0x5d0] sm:$0xff] }
  0x21   :  { %v748_v13 = vpack.c.bf16 %v202_v5, %v194_v4  ;;  %v208_v14 = vld [vmem:[%s1707_s1 + $0x608] sm:$0xff]  ;;  %v1213_v16 = vld.sshfl [vmem:[%s1708_s0] sm:$0x33 pattern:$0x76325410]  ;;  %v210_v17 = vld [vmem:[%s1707_s1 + $0x618] sm:$0xff]  ;;  %v686_v20 = vpack.c.bf16 %v199_v10, %v191_v7  ;;  %v750_v21 = vpack.c.bf16 %v201_v12, %v193_v11 }
  0x22   :  { %671 = vmatpush1.bf16.msra.mxu0 %v670_v34  ;;  %v216_v15 = vld [vmem:[%s1707_s1 + $0x648] sm:$0xff]  ;;  %v218_v18 = vld [vmem:[%s1707_s1 + $0x658] sm:$0xff]  ;;  %v1223_v19 = vcombine.high %v1213_v16, %v1213_v16  ;;  %v207_v23 = vld [vmem:[%s1707_s1 + $0x600] sm:$0xff] }
  0x23   :  { %735 = vmatpush1.bf16.msra.mxu1 %v734_v35  ;;  %673 = vmatprep.subr.bf16.mxu0 %v672_v36  ;;  %v688_v22 = vpack.c.bf16 %v216_v15, %v208_v14  ;;  %v215_v24 = vld [vmem:[%s1707_s1 + $0x640] sm:$0xff]  ;;  %v209_v25 = vld [vmem:[%s1707_s1 + $0x610] sm:$0xff]  ;;  %v752_v26 = vpack.c.bf16 %v218_v18, %v210_v17  ;;  %v224_v28 = vld [vmem:[%s1707_s1 + $0x688] sm:$0xff] }
  0x24   :  { %737 = vmatprep.subr.bf16.mxu1 %v736_v40  ;;  %v217_v27 = vld [vmem:[%s1707_s1 + $0x650] sm:$0xff]  ;;  %v232_v29 = vld [vmem:[%s1707_s1 + $0x6c8] sm:$0xff]  ;;  %388 = vmatprep.mubr.f32.mxu0 %v1223_v19  ;;  %v226_v30 = vld [vmem:[%s1707_s1 + $0x698] sm:$0xff]  ;;  %v690_v32 = vpack.c.bf16 %v215_v24, %v207_v23 }
  0x25   :  { %v234_v31 = vld [vmem:[%s1707_s1 + $0x6d8] sm:$0xff]  ;;  %459 = vmatprep.mubr.f32.mxu1 %v1223_v19  ;;  %v754_v33 = vpack.c.bf16 %v217_v27, %v209_v25  ;;  %v692_v34 = vpack.c.bf16 %v232_v29, %v224_v28  ;;  %v223_v35 = vld [vmem:[%s1707_s1 + $0x680] sm:$0xff]  ;;  %v225_v37 = vld [vmem:[%s1707_s1 + $0x690] sm:$0xff] }
  0x26   :  { %675 = vmatpush1.bf16.msra.mxu0 %v674_v46  ;;  %v231_v36 = vld [vmem:[%s1707_s1 + $0x6c0] sm:$0xff]  ;;  %v756_v38 = vpack.c.bf16 %v234_v31, %v226_v30  ;;  %v233_v39 = vld [vmem:[%s1707_s1 + $0x6d0] sm:$0xff]  ;;  %v240_v40 = vld [vmem:[%s1707_s1 + $0x708] sm:$0xff] }
  0x27   :  { %739 = vmatpush1.bf16.msra.mxu1 %v738_v47  ;;  %677 = vmatprep.subr.bf16.mxu0 %v676_v48  ;;  %v248_v41 = vld [vmem:[%s1707_s1 + $0x748] sm:$0xff]  ;;  %v242_v42 = vld [vmem:[%s1707_s1 + $0x718] sm:$0xff]  ;;  %v694_v44 = vpack.c.bf16 %v231_v36, %v223_v35  ;;  %v758_v45 = vpack.c.bf16 %v233_v39, %v225_v37  ;;  %v239_v47 = vld [vmem:[%s1707_s1 + $0x700] sm:$0xff] }
  0x28   :  { %741 = vmatprep.subr.bf16.mxu1 %v740_v52  ;;  %v250_v43 = vld [vmem:[%s1707_s1 + $0x758] sm:$0xff]  ;;  %v696_v46 = vpack.c.bf16 %v248_v41, %v240_v40  ;;  %v247_v48 = vld [vmem:[%s1707_s1 + $0x740] sm:$0xff]  ;;  %v241_v49 = vld [vmem:[%s1707_s1 + $0x710] sm:$0xff] }
  0x29   :  { %v760_v50 = vpack.c.bf16 %v250_v43, %v242_v42  ;;  %v249_v51 = vld [vmem:[%s1707_s1 + $0x750] sm:$0xff]  ;;  %v256_v52 = vld [vmem:[%s1707_s1 + $0x788] sm:$0xff]  ;;  %v258_v54 = vld [vmem:[%s1707_s1 + $0x798] sm:$0xff]  ;;  %v698_v56 = vpack.c.bf16 %v247_v48, %v239_v47 }
  0x2a   :  { %679 = vmatpush1.bf16.msra.mxu0 %v678_v58  ;;  %v264_v53 = vld [vmem:[%s1707_s1 + $0x7c8] sm:$0xff]  ;;  %v266_v55 = vld [vmem:[%s1707_s1 + $0x7d8] sm:$0xff]  ;;  %v762_v57 = vpack.c.bf16 %v249_v51, %v241_v49  ;;  %v257_v61 = vld [vmem:[%s1707_s1 + $0x790] sm:$0xff] }
  0x2b   :  { %743 = vmatpush1.bf16.msra.mxu1 %v742_v59  ;;  %681 = vmatprep.subr.bf16.mxu0 %v680_v60  ;;  %v700_v58 = vpack.c.bf16 %v264_v53, %v256_v52  ;;  %v255_v59 = vld [vmem:[%s1707_s1 + $0x780] sm:$0xff]  ;;  %v764_v62 = vpack.c.bf16 %v266_v55, %v258_v54  ;;  %v265_v63 = vld [vmem:[%s1707_s1 + $0x7d0] sm:$0xff]  ;;  %v28_v1 = vld [vmem:[%s1707_s1 + $0x68] sm:$0xff] }
  0x2c   :  { %745 = vmatprep.subr.bf16.mxu1 %v744_v0  ;;  %v263_v60 = vld [vmem:[%s1707_s1 + $0x7c0] sm:$0xff]  ;;  %v20_v0 = vld [vmem:[%s1707_s1 + $0x28] sm:$0xff]  ;;  %v22_v2 = vld [vmem:[%s1707_s1 + $0x38] sm:$0xff]  ;;  %v766_v5 = vpack.c.bf16 %v265_v63, %v257_v61 }
  0x2d   :  { %v30_v3 = vld [vmem:[%s1707_s1 + $0x78] sm:$0xff]  ;;  %v702_v4 = vpack.c.bf16 %v263_v60, %v255_v59  ;;  %v19_v7 = vld [vmem:[%s1707_s1 + $0x20] sm:$0xff]  ;;  %v29_v11 = vld [vmem:[%s1707_s1 + $0x70] sm:$0xff] }
  0x2e   :  { %683 = vmatpush1.bf16.msra.mxu0 %v682_v6  ;;  %v768_v6 = vpack.c.bf16 %v28_v1, %v20_v0  ;;  %v832_v10 = vpack.c.bf16 %v30_v3, %v22_v2  ;;  %v36_v12 = vld [vmem:[%s1707_s1 + $0xa8] sm:$0xff]  ;;  %v38_v14 = vld [vmem:[%s1707_s1 + $0xb8] sm:$0xff]  ;;  %v37_v23 = vld [vmem:[%s1707_s1 + $0xb0] sm:$0xff] }
  0x2f   :  { %747 = vmatpush1.bf16.msra.mxu1 %v746_v8  ;;  %685 = vmatprep.subr.bf16.mxu0 %v684_v9  ;;  %v27_v8 = vld [vmem:[%s1707_s1 + $0x60] sm:$0xff]  ;;  %v21_v9 = vld [vmem:[%s1707_s1 + $0x30] sm:$0xff]  ;;  %v46_v15 = vld [vmem:[%s1707_s1 + $0xf8] sm:$0xff] }
  0x30   :  { %749 = vmatprep.subr.bf16.mxu1 %v748_v13  ;;  %v44_v13 = vld [vmem:[%s1707_s1 + $0xe8] sm:$0xff]  ;;  %v770_v17 = vpack.c.bf16 %v27_v8, %v19_v7  ;;  %v834_v18 = vpack.c.bf16 %v29_v11, %v21_v9  ;;  %v836_v24 = vpack.c.bf16 %v46_v15, %v38_v14  ;;  %v45_v25 = vld [vmem:[%s1707_s1 + $0xf0] sm:$0xff]  ;;  %v54_v28 = vld [vmem:[%s1707_s1 + $0x138] sm:$0xff] }
  0x31   :  { %v60_v27 = vld [vmem:[%s1707_s1 + $0x168] sm:$0xff]  ;;  %v62_v29 = vld [vmem:[%s1707_s1 + $0x178] sm:$0xff]  ;;  %v838_v31 = vpack.c.bf16 %v45_v25, %v37_v23  ;;  %v53_v35 = vld [vmem:[%s1707_s1 + $0x130] sm:$0xff] }
  0x32   :  { %687 = vmatpush1.bf16.msra.mxu0 %v686_v20  ;;  %v772_v20 = vpack.c.bf16 %v44_v13, %v36_v12  ;;  %v840_v36 = vpack.c.bf16 %v62_v29, %v54_v28  ;;  %v61_v37 = vld [vmem:[%s1707_s1 + $0x170] sm:$0xff]  ;;  %v76_v39 = vld [vmem:[%s1707_s1 + $0x1e8] sm:$0xff]  ;;  %v70_v40 = vld [vmem:[%s1707_s1 + $0x1b8] sm:$0xff] }
  0x33   :  { %751 = vmatpush1.bf16.msra.mxu1 %v750_v21  ;;  %689 = vmatprep.subr.bf16.mxu0 %v688_v22  ;;  %v35_v21 = vld [vmem:[%s1707_s1 + $0xa0] sm:$0xff]  ;;  %v78_v41 = vld [vmem:[%s1707_s1 + $0x1f8] sm:$0xff]  ;;  %v842_v43 = vpack.c.bf16 %v61_v37, %v53_v35  ;;  %v69_v47 = vld [vmem:[%s1707_s1 + $0x1b0] sm:$0xff] }
  0x34   :  { %753 = vmatprep.subr.bf16.mxu1 %v752_v26  ;;  %v43_v22 = vld [vmem:[%s1707_s1 + $0xe0] sm:$0xff]  ;;  %v52_v26 = vld [vmem:[%s1707_s1 + $0x128] sm:$0xff]  ;;  %v77_v48 = vld [vmem:[%s1707_s1 + $0x1f0] sm:$0xff] }
  0x35   :  { %v774_v30 = vpack.c.bf16 %v43_v22, %v35_v21  ;;  %v84_v49 = vld [vmem:[%s1707_s1 + $0x228] sm:$0xff]  ;;  %v86_v51 = vld [vmem:[%s1707_s1 + $0x238] sm:$0xff]  ;;  %v846_v54 = vpack.c.bf16 %v77_v48, %v69_v47  ;;  %v93_v60 = vld [vmem:[%s1707_s1 + $0x270] sm:$0xff] }
  0x36   :  { %691 = vmatpush1.bf16.msra.mxu0 %v690_v32  ;;  %v776_v32 = vpack.c.bf16 %v60_v27, %v52_v26  ;;  %v94_v52 = vld [vmem:[%s1707_s1 + $0x278] sm:$0xff]  ;;  %v100_v61 = vld [vmem:[%s1707_s1 + $0x2a8] sm:$0xff]  ;;  %v109_v8 = vld [vmem:[%s1707_s1 + $0x2f0] sm:$0xff] }
  0x37   :  { %755 = vmatpush1.bf16.msra.mxu1 %v754_v33  ;;  %693 = vmatprep.subr.bf16.mxu0 %v692_v34  ;;  %v51_v33 = vld [vmem:[%s1707_s1 + $0x120] sm:$0xff]  ;;  %v848_v59 = vpack.c.bf16 %v94_v52, %v86_v51  ;;  %v102_v63 = vld [vmem:[%s1707_s1 + $0x2b8] sm:$0xff]  ;;  %v116_v9 = vld [vmem:[%s1707_s1 + $0x328] sm:$0xff] }
  0x38   :  { %757 = vmatprep.subr.bf16.mxu1 %v756_v38  ;;  %v59_v34 = vld [vmem:[%s1707_s1 + $0x160] sm:$0xff]  ;;  %v68_v38 = vld [vmem:[%s1707_s1 + $0x1a8] sm:$0xff]  ;;  %v110_v0 = vld [vmem:[%s1707_s1 + $0x2f8] sm:$0xff] }
  0x39   :  { %v778_v42 = vpack.c.bf16 %v59_v34, %v51_v33  ;;  %v852_v7 = vpack.c.bf16 %v110_v0, %v102_v63  ;;  %v118_v11 = vld [vmem:[%s1707_s1 + $0x338] sm:$0xff]  ;;  %v125_v22 = vld [vmem:[%s1707_s1 + $0x370] sm:$0xff]  ;;  %v132_v23 = vld [vmem:[%s1707_s1 + $0x3a8] sm:$0xff] }
  0x3a   :  { %695 = vmatpush1.bf16.msra.mxu0 %v694_v44  ;;  %v780_v44 = vpack.c.bf16 %v76_v39, %v68_v38  ;;  %v126_v12 = vld [vmem:[%s1707_s1 + $0x378] sm:$0xff]  ;;  %v141_v34 = vld [vmem:[%s1707_s1 + $0x3f0] sm:$0xff]  ;;  %v148_v35 = vld [vmem:[%s1707_s1 + $0x428] sm:$0xff] }
  0x3b   :  { %759 = vmatpush1.bf16.msra.mxu1 %v758_v45  ;;  %697 = vmatprep.subr.bf16.mxu0 %v696_v46  ;;  %v67_v45 = vld [vmem:[%s1707_s1 + $0x1a0] sm:$0xff]  ;;  %v856_v21 = vpack.c.bf16 %v126_v12, %v118_v11  ;;  %v134_v25 = vld [vmem:[%s1707_s1 + $0x3b8] sm:$0xff]  ;;  %v164_v47 = vld [vmem:[%s1707_s1 + $0x4a8] sm:$0xff] }
  0x3c   :  { %761 = vmatprep.subr.bf16.mxu1 %v760_v50  ;;  %v75_v46 = vld [vmem:[%s1707_s1 + $0x1e0] sm:$0xff]  ;;  %v92_v50 = vld [vmem:[%s1707_s1 + $0x268] sm:$0xff]  ;;  %v142_v26 = vld [vmem:[%s1707_s1 + $0x3f8] sm:$0xff] }
  0x3d   :  { %v782_v53 = vpack.c.bf16 %v75_v46, %v67_v45  ;;  %v784_v55 = vpack.c.bf16 %v92_v50, %v84_v49  ;;  %v860_v33 = vpack.c.bf16 %v142_v26, %v134_v25  ;;  %v150_v37 = vld [vmem:[%s1707_s1 + $0x438] sm:$0xff]  ;;  %v157_v46 = vld [vmem:[%s1707_s1 + $0x470] sm:$0xff] }
  0x3e   :  { %699 = vmatpush1.bf16.msra.mxu0 %v698_v56  ;;  %v83_v56 = vld [vmem:[%s1707_s1 + $0x220] sm:$0xff]  ;;  %v158_v38 = vld [vmem:[%s1707_s1 + $0x478] sm:$0xff] }
  0x3f   :  { %763 = vmatpush1.bf16.msra.mxu1 %v762_v57  ;;  %701 = vmatprep.subr.bf16.mxu0 %v700_v58  ;;  %v91_v57 = vld [vmem:[%s1707_s1 + $0x260] sm:$0xff]  ;;  %v85_v58 = vld [vmem:[%s1707_s1 + $0x230] sm:$0xff]  ;;  %v864_v45 = vpack.c.bf16 %v158_v38, %v150_v37  ;;  %v166_v48 = vld [vmem:[%s1707_s1 + $0x4b8] sm:$0xff] }
  0x40   :  { %765 = vmatprep.subr.bf16.mxu1 %v764_v62  ;;  %v108_v62 = vld [vmem:[%s1707_s1 + $0x2e8] sm:$0xff]  ;;  %v786_v1 = vpack.c.bf16 %v91_v57, %v83_v56  ;;  %v850_v2 = vpack.c.bf16 %v93_v60, %v85_v58  ;;  %v174_v49 = vld [vmem:[%s1707_s1 + $0x4f8] sm:$0xff]  ;;  %v173_v57 = vld [vmem:[%s1707_s1 + $0x4f0] sm:$0xff] }
  0x41   :  { %v788_v3 = vpack.c.bf16 %v108_v62, %v100_v61  ;;  %v868_v56 = vpack.c.bf16 %v174_v49, %v166_v48  ;;  %v180_v58 = vld [vmem:[%s1707_s1 + $0x528] sm:$0xff]  ;;  %v182_v60 = vld [vmem:[%s1707_s1 + $0x538] sm:$0xff] }
  0x42   :  { %703 = vmatpush1.bf16.msra.mxu0 %v702_v4  ;;  %v99_v4 = vld [vmem:[%s1707_s1 + $0x2a0] sm:$0xff]  ;;  %v190_v61 = vld [vmem:[%s1707_s1 + $0x578] sm:$0xff] }
  0x43   :  { %767 = vmatpush1.bf16.msra.mxu1 %v766_v5  ;;  %769 = vmatprep.subr.bf16.mxu0 %v768_v6  ;;  %v107_v5 = vld [vmem:[%s1707_s1 + $0x2e0] sm:$0xff]  ;;  %v101_v6 = vld [vmem:[%s1707_s1 + $0x2b0] sm:$0xff] }
  0x44   :  { %833 = vmatprep.subr.bf16.mxu1 %v832_v10  ;;  %v124_v10 = vld [vmem:[%s1707_s1 + $0x368] sm:$0xff]  ;;  %v790_v13 = vpack.c.bf16 %v107_v5, %v99_v4  ;;  %v854_v14 = vpack.c.bf16 %v109_v8, %v101_v6  ;;  %v872_v4 = vpack.c.bf16 %v190_v61, %v182_v60  ;;  %v189_v5 = vld [vmem:[%s1707_s1 + $0x570] sm:$0xff]  ;;  %v198_v8 = vld [vmem:[%s1707_s1 + $0x5b8] sm:$0xff] }
  0x45   :  { %389 = vmatmul.mubr.f32.vlgmr.msra.gmra.mrb[0].mxu0 %v1213_v16  ;;  %v792_v15 = vpack.c.bf16 %v124_v10, %v116_v9  ;;  %v196_v6 = vld [vmem:[%s1707_s1 + $0x5a8] sm:$0xff]  ;;  %v206_v9 = vld [vmem:[%s1707_s1 + $0x5f8] sm:$0xff] }
  0x46   :  { %460 = vmatmul.mubr.f32.vlgmr.msra.gmra.mrb[0].mxu1 %v1213_v16  ;;  %771 = vmatpush1.bf16.msra.mxu0 %v770_v17  ;;  %v115_v17 = vld [vmem:[%s1707_s1 + $0x320] sm:$0xff] }
  0x47   :  { %835 = vmatpush1.bf16.msra.mxu1 %v834_v18  ;;  %773 = vmatprep.subr.bf16.mxu0 %v772_v20  ;;  %v123_v18 = vld [vmem:[%s1707_s1 + $0x360] sm:$0xff]  ;;  %v117_v20 = vld [vmem:[%s1707_s1 + $0x330] sm:$0xff] }
  0x48   :  { %837 = vmatprep.subr.bf16.mxu1 %v836_v24  ;;  %530 = vmatprep.mubr.f32.mxu0 %v1223_v19  ;;  %v140_v24 = vld [vmem:[%s1707_s1 + $0x3e8] sm:$0xff]  ;;  %v794_v27 = vpack.c.bf16 %v123_v18, %v115_v17  ;;  %v858_v28 = vpack.c.bf16 %v125_v22, %v117_v20  ;;  %v876_v17 = vpack.c.bf16 %v206_v9, %v198_v8  ;;  %v205_v18 = vld [vmem:[%s1707_s1 + $0x5f0] sm:$0xff]  ;;  %v214_v22 = vld [vmem:[%s1707_s1 + $0x638] sm:$0xff] }
  0x49   :  { %601 = vmatprep.mubr.f32.mxu1 %v1223_v19  ;;  %v844_v19 = vpack.c.bf16 %v78_v41, %v70_v40  ;;  %v796_v29 = vpack.c.bf16 %v140_v24, %v132_v23  ;;  %v212_v20 = vld [vmem:[%s1707_s1 + $0x628] sm:$0xff]  ;;  %v222_v23 = vld [vmem:[%s1707_s1 + $0x678] sm:$0xff]  ;;  %v271_v8 = vld [vmem:[%s1709_s2] sm:$0xff] }
  0x4a   :  { %775 = vmatpush1.bf16.msra.mxu0 %v774_v30  ;;  %v131_v30 = vld [vmem:[%s1707_s1 + $0x3a0] sm:$0xff] }
  0x4b   :  { %839 = vmatpush1.bf16.msra.mxu1 %v838_v31  ;;  %777 = vmatprep.subr.bf16.mxu0 %v776_v32  ;;  %v139_v31 = vld [vmem:[%s1707_s1 + $0x3e0] sm:$0xff]  ;;  %v133_v32 = vld [vmem:[%s1707_s1 + $0x3b0] sm:$0xff] }
  0x4c   :  { %841 = vmatprep.subr.bf16.mxu1 %v840_v36  ;;  %v156_v36 = vld [vmem:[%s1707_s1 + $0x468] sm:$0xff]  ;;  %v798_v39 = vpack.c.bf16 %v139_v31, %v131_v30  ;;  %v862_v40 = vpack.c.bf16 %v141_v34, %v133_v32  ;;  %v880_v30 = vpack.c.bf16 %v222_v23, %v214_v22  ;;  %v221_v31 = vld [vmem:[%s1707_s1 + $0x670] sm:$0xff]  ;;  %v230_v34 = vld [vmem:[%s1707_s1 + $0x6b8] sm:$0xff] }
  0x4d   :  { %v800_v41 = vpack.c.bf16 %v156_v36, %v148_v35  ;;  %v228_v32 = vld [vmem:[%s1707_s1 + $0x6a8] sm:$0xff]  ;;  %v238_v35 = vld [vmem:[%s1707_s1 + $0x6f8] sm:$0xff] }
  0x4e   :  { %779 = vmatpush1.bf16.msra.mxu0 %v778_v42  ;;  %v147_v42 = vld [vmem:[%s1707_s1 + $0x420] sm:$0xff] }
  0x4f   :  { %843 = vmatpush1.bf16.msra.mxu1 %v842_v43  ;;  %781 = vmatprep.subr.bf16.mxu0 %v780_v44  ;;  %v155_v43 = vld [vmem:[%s1707_s1 + $0x460] sm:$0xff]  ;;  %v149_v44 = vld [vmem:[%s1707_s1 + $0x430] sm:$0xff] }
  0x50   :  { %845 = vmatprep.subr.bf16.mxu1 %v844_v19  ;;  %v172_v19 = vld [vmem:[%s1707_s1 + $0x4e8] sm:$0xff]  ;;  %v802_v50 = vpack.c.bf16 %v155_v43, %v147_v42  ;;  %v866_v51 = vpack.c.bf16 %v157_v46, %v149_v44  ;;  %v884_v42 = vpack.c.bf16 %v238_v35, %v230_v34  ;;  %v237_v43 = vld [vmem:[%s1707_s1 + $0x6f0] sm:$0xff]  ;;  %v246_v46 = vld [vmem:[%s1707_s1 + $0x738] sm:$0xff] }
  0x51   :  { %v804_v52 = vpack.c.bf16 %v172_v19, %v164_v47  ;;  %v244_v44 = vld [vmem:[%s1707_s1 + $0x728] sm:$0xff]  ;;  %v254_v47 = vld [vmem:[%s1707_s1 + $0x778] sm:$0xff] }
  0x52   :  { %783 = vmatpush1.bf16.msra.mxu0 %v782_v53  ;;  %v163_v53 = vld [vmem:[%s1707_s1 + $0x4a0] sm:$0xff] }
  0x53   :  { %847 = vmatpush1.bf16.msra.mxu1 %v846_v54  ;;  %785 = vmatprep.subr.bf16.mxu0 %v784_v55  ;;  %v171_v54 = vld [vmem:[%s1707_s1 + $0x4e0] sm:$0xff]  ;;  %v165_v55 = vld [vmem:[%s1707_s1 + $0x4b0] sm:$0xff] }
  0x54   :  { %849 = vmatprep.subr.bf16.mxu1 %v848_v59  ;;  %v188_v59 = vld [vmem:[%s1707_s1 + $0x568] sm:$0xff]  ;;  %v806_v62 = vpack.c.bf16 %v171_v54, %v163_v53  ;;  %v870_v63 = vpack.c.bf16 %v173_v57, %v165_v55  ;;  %v888_v53 = vpack.c.bf16 %v254_v47, %v246_v46  ;;  %v253_v54 = vld [vmem:[%s1707_s1 + $0x770] sm:$0xff]  ;;  %v262_v57 = vld [vmem:[%s1707_s1 + $0x7b8] sm:$0xff] }
  0x55   :  { %v808_v0 = vpack.c.bf16 %v188_v59, %v180_v58  ;;  %v260_v55 = vld [vmem:[%s1707_s1 + $0x7a8] sm:$0xff]  ;;  %v270_v58 = vld [vmem:[%s1707_s1 + $0x7f8] sm:$0xff] }
  0x56   :  { %787 = vmatpush1.bf16.msra.mxu0 %v786_v1  ;;  %v179_v1 = vld [vmem:[%s1707_s1 + $0x520] sm:$0xff] }
  0x57   :  { %851 = vmatpush1.bf16.msra.mxu1 %v850_v2  ;;  %789 = vmatprep.subr.bf16.mxu0 %v788_v3  ;;  %v187_v2 = vld [vmem:[%s1707_s1 + $0x560] sm:$0xff]  ;;  %v181_v3 = vld [vmem:[%s1707_s1 + $0x530] sm:$0xff] }
  0x58   :  { %853 = vmatprep.subr.bf16.mxu1 %v852_v7  ;;  %v204_v7 = vld [vmem:[%s1707_s1 + $0x5e8] sm:$0xff]  ;;  %v810_v10 = vpack.c.bf16 %v187_v2, %v179_v1  ;;  %v874_v11 = vpack.c.bf16 %v189_v5, %v181_v3  ;;  %v261_v1 = vld [vmem:[%s1707_s1 + $0x7b0] sm:$0xff]  ;;  %v273_v5 = vlaneseq }
  0x59   :  { %v812_v12 = vpack.c.bf16 %v204_v7, %v196_v6  ;;  %v269_v2 = vld [vmem:[%s1707_s1 + $0x7f0] sm:$0xff] }
  0x5a   :  { %791 = vmatpush1.bf16.msra.mxu0 %v790_v13  ;;  %v195_v13 = vld [vmem:[%s1707_s1 + $0x5a0] sm:$0xff]  ;;  %v274_v6 = vshrl.u32 %v273_v5, 7 }
  0x5b   :  { %855 = vmatpush1.bf16.msra.mxu1 %v854_v14  ;;  %793 = vmatprep.subr.bf16.mxu0 %v792_v15  ;;  %v203_v14 = vld [vmem:[%s1707_s1 + $0x5e0] sm:$0xff]  ;;  %v197_v15 = vld [vmem:[%s1707_s1 + $0x5b0] sm:$0xff] }
  0x5c   :  { %857 = vmatprep.subr.bf16.mxu1 %v856_v21  ;;  %v220_v21 = vld [vmem:[%s1707_s1 + $0x668] sm:$0xff]  ;;  %v814_v24 = vpack.c.bf16 %v203_v14, %v195_v13  ;;  %v878_v25 = vpack.c.bf16 %v205_v18, %v197_v15  ;;  %v275_v7 = vsub.s32 0, %v274_v6  ;;  %v283_v9 = vsub.s32 2, %v274_v6 }
  0x5d   :  { %v816_v26 = vpack.c.bf16 %v220_v21, %v212_v20  ;;  %v303_v34 = vsub.s32 7, %v274_v6 }
  0x5e   :  { %795 = vmatpush1.bf16.msra.mxu0 %v794_v27  ;;  %v211_v27 = vld [vmem:[%s1707_s1 + $0x620] sm:$0xff]  ;;  %v284_v13 = vrot.slane %v271_v8, %v283_v9 }
  0x5f   :  { %859 = vmatpush1.bf16.msra.mxu1 %v858_v28  ;;  %797 = vmatprep.subr.bf16.mxu0 %v796_v29  ;;  %v219_v28 = vld [vmem:[%s1707_s1 + $0x660] sm:$0xff]  ;;  %v213_v29 = vld [vmem:[%s1707_s1 + $0x630] sm:$0xff] }
  0x60   :  { %861 = vmatprep.subr.bf16.mxu1 %v860_v33  ;;  %v236_v33 = vld [vmem:[%s1707_s1 + $0x6e8] sm:$0xff]  ;;  %v818_v36 = vpack.c.bf16 %v219_v28, %v211_v27  ;;  %v882_v37 = vpack.c.bf16 %v221_v31, %v213_v29  ;;  %v291_v31 = vsub.s32 4, %v274_v6 }
  0x61   :  { %v820_v38 = vpack.c.bf16 %v236_v33, %v228_v32  ;;  %v299_v32 = vsub.s32 6, %v274_v6  ;;  %v295_v33 = vsub.s32 5, %v274_v6 }
  0x62   :  { %799 = vmatpush1.bf16.msra.mxu0 %v798_v39  ;;  %v227_v39 = vld [vmem:[%s1707_s1 + $0x6a0] sm:$0xff]  ;;  %v292_v35 = vrot.slane %v271_v8, %v291_v31 }
  0x63   :  { %863 = vmatpush1.bf16.msra.mxu1 %v862_v40  ;;  %801 = vmatprep.subr.bf16.mxu0 %v800_v41  ;;  %v235_v40 = vld [vmem:[%s1707_s1 + $0x6e0] sm:$0xff]  ;;  %v229_v41 = vld [vmem:[%s1707_s1 + $0x6b0] sm:$0xff] }
  0x64   :  { %865 = vmatprep.subr.bf16.mxu1 %v864_v45  ;;  %v252_v45 = vld [vmem:[%s1707_s1 + $0x768] sm:$0xff]  ;;  %v822_v19 = vpack.c.bf16 %v235_v40, %v227_v39  ;;  %v886_v48 = vpack.c.bf16 %v237_v43, %v229_v41 }
  0x65   :  { %v824_v49 = vpack.c.bf16 %v252_v45, %v244_v44 }
  0x66   :  { %803 = vmatpush1.bf16.msra.mxu0 %v802_v50  ;;  %v243_v50 = vld [vmem:[%s1707_s1 + $0x720] sm:$0xff] }
  0x67   :  { %867 = vmatpush1.bf16.msra.mxu1 %v866_v51  ;;  %805 = vmatprep.subr.bf16.mxu0 %v804_v52  ;;  %v251_v51 = vld [vmem:[%s1707_s1 + $0x760] sm:$0xff]  ;;  %v245_v52 = vld [vmem:[%s1707_s1 + $0x730] sm:$0xff] }
  0x68   :  { %869 = vmatprep.subr.bf16.mxu1 %v868_v56  ;;  %v268_v56 = vld [vmem:[%s1707_s1 + $0x7e8] sm:$0xff]  ;;  %v826_v59 = vpack.c.bf16 %v251_v51, %v243_v50  ;;  %v890_v60 = vpack.c.bf16 %v253_v54, %v245_v52 }
  0x69   :  { %v828_v61 = vpack.c.bf16 %v268_v56, %v260_v55 }
  0x6a   :  { %807 = vmatpush1.bf16.msra.mxu0 %v806_v62  ;;  %v259_v62 = vld [vmem:[%s1707_s1 + $0x7a0] sm:$0xff] }
  0x6b   :  { %871 = vmatpush1.bf16.msra.mxu1 %v870_v63  ;;  %809 = vmatprep.subr.bf16.mxu0 %v808_v0  ;;  %v267_v63 = vld [vmem:[%s1707_s1 + $0x7e0] sm:$0xff]  ;;  %v892_v0 = vpack.c.bf16 %v270_v58, %v262_v57 }
  0x6c   :  { %873 = vmatprep.subr.bf16.mxu1 %v872_v4  ;;  %v830_v3 = vpack.c.bf16 %v267_v63, %v259_v62  ;;  %v894_v4 = vpack.c.bf16 %v269_v2, %v261_v1 }
  0x6e   :  { %811 = vmatpush1.bf16.msra.mxu0 %v810_v10  ;;  %v279_v10 = vsub.s32 1, %v274_v6 }
  0x6f   :  { %875 = vmatpush1.bf16.msra.mxu1 %v874_v11  ;;  %813 = vmatprep.subr.bf16.mxu0 %v812_v12  ;;  %v287_v11 = vsub.s32 3, %v274_v6  ;;  %v276_v12 = vrot.slane %v271_v8, %v275_v7 }
  0x70   :  { %877 = vmatprep.subr.bf16.mxu1 %v876_v17  ;;  %v280_v14 = vrot.slane %v271_v8, %v279_v10 }
  0x71   :  { %v288_v15 = vrot.slane %v271_v8, %v287_v11 }
  0x72   :  { %815 = vmatpush1.bf16.msra.mxu0 %v814_v24 }
  0x73   :  { %879 = vmatpush1.bf16.msra.mxu1 %v878_v25  ;;  %817 = vmatprep.subr.bf16.mxu0 %v816_v26 }
  0x74   :  { %881 = vmatprep.subr.bf16.mxu1 %v880_v30 }
  0x76   :  { %819 = vmatpush1.bf16.msra.mxu0 %v818_v36  ;;  %v300_v36 = vrot.slane %v271_v8, %v299_v32 }
  0x77   :  { %883 = vmatpush1.bf16.msra.mxu1 %v882_v37  ;;  %821 = vmatprep.subr.bf16.mxu0 %v820_v38  ;;  %v296_v37 = vrot.slane %v271_v8, %v295_v33  ;;  %v304_v38 = vrot.slane %v271_v8, %v303_v34 }
  0x78   :  { %885 = vmatprep.subr.bf16.mxu1 %v884_v42 }
  0x7a   :  { %823 = vmatpush1.bf16.msra.mxu0 %v822_v19 }
  0x7b   :  { %887 = vmatpush1.bf16.msra.mxu1 %v886_v48  ;;  %825 = vmatprep.subr.bf16.mxu0 %v824_v49 }
  0x7c   :  { %889 = vmatprep.subr.bf16.mxu1 %v888_v53 }
  0x7e   :  { %827 = vmatpush1.bf16.msra.mxu0 %v826_v59 }
  0x7f   :  { %891 = vmatpush1.bf16.msra.mxu1 %v890_v60  ;;  %829 = vmatprep.subr.bf16.mxu0 %v828_v61 }
  0x80   :  { %893 = vmatprep.subr.bf16.mxu1 %v892_v0 }
  0x82   :  { %831 = vmatpush1.bf16.msra.mxu0 %v830_v3 }
  0x83   :  { %895 = vmatpush1.bf16.msra.mxu1 %v894_v4 }
  0x85   :  { %531 = vmatmul.mubr.f32.vlgmr.msra.gmra.mrb[2].mxu0 %v1213_v16 }
  0x86   :  { %602 = vmatmul.mubr.f32.vlgmr.msra.gmra.mrb[2].mxu1 %v1213_v16 }
 0x118   :  { %v390_v17 = vpop.f32.mrb[0].mxu0 }
 0x119   :  { %v391_v18 = vadd.f32 %v390_v17, %v276_v12  ;;  %v461_v20 = vpop.f32.mrb[0].mxu1  ;;  %v392_v21 = vpop.f32.mrb[1].mxu0 }
 0x11a   :  { %v462_v22 = vadd.f32 %v461_v20, %v284_v13  ;;  %v393_v16 = vadd.f32 %v392_v21, %v280_v14  ;;  %v463_v23 = vpop.f32.mrb[1].mxu1 }
 0x11b   :  { %v608_v24 = vmax.f32 %v391_v18, 0.0  ;;  %v464_v25 = vadd.f32 %v463_v23, %v288_v15 }
 0x11c   :  { %v610_v26 = vmax.f32 %v462_v22, 0.0  ;;  %v609_v27 = vmax.f32 %v393_v16, 0.0 }
 0x11d   :  { %v611_v28 = vmax.f32 %v464_v25, 0.0 }
 0x11e   :  { %v616_v29 = vmax.f32 %v608_v24, %v610_v26 }
 0x11f   :  { %v617_v30 = vmax.f32 %v609_v27, %v611_v28 }
 0x158   :  { %v532_v39 = vpop.f32.mrb[2].mxu0 }
 0x159   :  { %v533_v40 = vadd.f32 %v532_v39, %v292_v35  ;;  %v603_v41 = vpop.f32.mrb[2].mxu1  ;;  %v534_v42 = vpop.f32.mrb[3].mxu0 }
 0x15a   :  { %v604_v43 = vadd.f32 %v603_v41, %v300_v36  ;;  %v535_v44 = vadd.f32 %v534_v42, %v296_v37  ;;  %v605_v45 = vpop.f32.mrb[3].mxu1 }
 0x15b   :  { %v612_v46 = vmax.f32 %v533_v40, 0.0  ;;  %v606_v47 = vadd.f32 %v605_v45, %v304_v38 }
 0x15c   :  { %v614_v19 = vmax.f32 %v604_v43, 0.0  ;;  %v613_v48 = vmax.f32 %v535_v44, 0.0 }
 0x15d   :  { %v615_v49 = vmax.f32 %v606_v47, 0.0 }
 0x15e   :  { %v618_v50 = vmax.f32 %v612_v46, %v614_v19 }
 0x15f   :  { %v619_v51 = vmax.f32 %v613_v48, %v615_v49 }
 0x160   :  { %v620_v52 = vmax.f32 %v616_v29, %v618_v50 }
 0x161   :  { %v621_v53 = vmax.f32 %v617_v30, %v619_v51 }
 0x163   :  { %v624_v54 = vcombine.low %v620_v52, %v621_v53 }
 0x165   :  { %639 = vst.sshfl [vmem:[%s1710_s3] sm:$0x33 pattern:$0x76325410] %v624_v54 }

</bundles_post_ra>
